<compile_context>
chip_gen: v5e
topology: v5e:2x2
jax: 0.10.0
libtpu: 0.0.40
codegen_flags: <defaults>
</compile_context>

<pallas_src>
import functools

import jax
import jax.numpy as jnp
from jax.experimental import pallas as pl
from jax.experimental.pallas import tpu as pltpu


# --------------------------------------------------------------------------- #
# Small compat / helper utilities
# --------------------------------------------------------------------------- #

_CompilerParams = getattr(pltpu, "CompilerParams", None) or getattr(
    pltpu, "TPUCompilerParams", None
)


def _mosaic_params(dimension_semantics):
    if _CompilerParams is None:
        return None
    return _CompilerParams(dimension_semantics=dimension_semantics)


def _pick_batch_block(batch, num_classes, block_b, itemsize=4):
    """Pick a batch tile size.

    Keeps a single (tb, C) f32 block <= ~2 MiB so (inputs + outputs) x 2
    pipeline buffers stays far under v7x's 64 MiB VMEM and v5e's 16 MiB scoped
    default.  `block_b`, if given, should be a multiple of 8 or equal to B.
    """
    if block_b is not None:
        return max(1, min(int(block_b), batch))
    budget = 2 * 1024 * 1024
    tb = max(8, min(128, budget // max(1, num_classes * itemsize)))
    tb = max(8, (tb // 8) * 8)
    return min(batch, tb)


# --------------------------------------------------------------------------- #
# Kernels
# --------------------------------------------------------------------------- #

def _ce_kernel(logits_ref, labels_ref, loss_ref):
    """Per-tile cross entropy: loss[r] = logsumexp(x[r, :]) - x[r, label[r]]."""
    x = logits_ref[...].astype(jnp.float32)                  # (TB, C)
    tb, c = x.shape
    m = jnp.max(x, axis=1, keepdims=True)                    # (TB, 1)
    s = jnp.sum(jnp.exp(x - m), axis=1, keepdims=True)       # (TB, 1)
    cols = jax.lax.broadcasted_iota(jnp.int32, (tb, c), 1)
    onehot = (cols == labels_ref[...]).astype(jnp.float32)   # (TB, C)
    label_logit = jnp.sum(x * onehot, axis=1, keepdims=True) # (TB, 1)
    loss_ref[...] = m + jnp.log(s) - label_logit             # (TB, 1), no logsm pass


def _selc_kernel(idx_ref, logits_ref, old_soft_ref, table_out_ref, loss_ref,
                 *, momentum):
    """One sample per grid step: fused gather -> momentum update -> scatter."""
    del idx_ref  # only consumed by the index_maps (row gather/scatter)
    x = logits_ref[...].astype(jnp.float32)                  # (1, C)
    m = jnp.max(x, axis=1, keepdims=True)
    s = jnp.sum(jnp.exp(x - m), axis=1, keepdims=True)
    logsm = (x - m) - jnp.log(s)                             # log_softmax(logits)
    smax = jnp.exp(logsm)                                    # softmax, divide-free (EUP)
    old = old_soft_ref[...].astype(jnp.float32)
    new_soft = momentum * old + (1.0 - momentum) * smax
    table_out_ref[...] = new_soft.astype(table_out_ref.dtype)        # scatter row
    loss_ref[...] = -jnp.sum(logsm * new_soft, axis=1, keepdims=True)  # (1, 1)


# --------------------------------------------------------------------------- #
# Wrappers
# --------------------------------------------------------------------------- #

@functools.partial(jax.jit, static_argnames=("block_b",))
def ce_loss_pallas(logits, labels, *, block_b=None):
    """Mean cross-entropy with integer labels (epoch <= es branch)."""
    B, C = logits.shape
    tb = _pick_batch_block(B, C, block_b)
    labels2d = labels.astype(jnp.int32).reshape(B, 1)

    per_sample = pl.pallas_call(
        _ce_kernel,
        out_shape=jax.ShapeDtypeStruct((B, 1), jnp.float32),
        grid_spec=pltpu.PrefetchScalarGridSpec(
            num_scalar_prefetch=0,
            grid=(pl.cdiv(B, tb),),
            in_specs=[
                pl.BlockSpec((tb, C), lambda i: (i, 0)),   # logits tile
                pl.BlockSpec((tb, 1), lambda i: (i, 0)),   # labels tile
            ],
            out_specs=pl.BlockSpec((tb, 1), lambda i: (i, 0)),
        ),
        compiler_params=_mosaic_params(("parallel",)),      # 2 TCs on v7x
    )(logits, labels2d)
    return jnp.mean(per_sample)


@functools.partial(jax.jit, static_argnames=("momentum",),
                   donate_argnames=("soft_labels",))
def selc_loss_pallas(logits, soft_labels, index, *, momentum):
    """SELC branch: fused gather + momentum update + scatter + loss.

    Returns (mean_loss, updated soft_labels table).  The table input is aliased
    to the table output, so untouched rows are preserved and (when the caller
    donates the buffer, as this jit does) the update happens in place.
    """
    B, C = logits.shape
    N, C2 = soft_labels.shape
    assert C == C2, (C, C2)
    index = index.astype(jnp.int32)
    kernel = functools.partial(_selc_kernel, momentum=float(momentum))

    new_table, per_sample = pl.pallas_call(
        kernel,
        out_shape=(
            jax.ShapeDtypeStruct((N, C), soft_labels.dtype),  # updated table
            jax.ShapeDtypeStruct((B, 1), jnp.float32),        # per-sample loss
        ),
        grid_spec=pltpu.PrefetchScalarGridSpec(
            num_scalar_prefetch=1,                            # `index` -> SMEM
            grid=(B,),
            in_specs=[
                pl.BlockSpec((1, C), lambda i, idx: (i, 0)),       # logits row i
                pl.BlockSpec((1, C), lambda i, idx: (idx[i], 0)),  # gathered soft row
            ],
            out_specs=[
                pl.BlockSpec((1, C), lambda i, idx: (idx[i], 0)),  # scatter soft row
                pl.BlockSpec((1, 1), lambda i, idx: (i, 0)),       # per-sample loss
            ],
        ),
        # Call args are (index, logits, soft_labels) -> soft_labels is input 2.
        input_output_aliases={2: 0},
        # Data-dependent output index_map -> keep the axis "arbitrary" (safe).
        compiler_params=_mosaic_params(("arbitrary",)),
    )(index, logits, soft_labels)
    return jnp.mean(per_sample), new_table


class SELCLossPallas:
    """JAX/Pallas port of SELCLoss; soft_labels state kept as a jnp array."""

    def __init__(self, labels, num_classes, es=10, momentum=0.9,
                 block_b=None, soft_labels_dtype=jnp.float32):
        labels = jnp.asarray(labels, dtype=jnp.int32)
        self.num_classes = num_classes
        self.es = es
        # NOTE: momentum is a static (Python float) compile-time constant;
        # changing it at runtime retriggers compilation.
        self.momentum = float(momentum)
        self.block_b = block_b
        # one-hot init, same as torch: soft_labels[arange(N), labels] = 1
        # (soft_labels_dtype=jnp.bfloat16 halves HBM traffic at small precision cost)
        self.soft_labels = jax.nn.one_hot(labels, num_classes,
                                          dtype=soft_labels_dtype)

    def forward(self, logits, labels, index, epoch):
        if epoch <= self.es:
            return ce_loss_pallas(logits, labels, block_b=self.block_b)
        loss, new_table = selc_loss_pallas(
            logits, self.soft_labels, jnp.asarray(index, jnp.int32),
            momentum=self.momentum)
        self.soft_labels = new_table
        return loss

    __call__ = forward


# TODO(synk): for vocab-scale C, add a class-axis grid with an online
#             (flash-style) max/sum pass instead of whole-row blocks.


if __name__ == "__main__":
    key = jax.random.PRNGKey(0)
    N, C, B = 64, 16, 16          # dataset size, num_classes, batch size

    k1, k2, k3 = jax.random.split(key, 3)
    dataset_labels = jax.random.randint(k1, (N,), 0, C, dtype=jnp.int32)
    logits = jax.random.normal(k2, (B, C), dtype=jnp.float32)
    index = jax.random.permutation(k3, N)[:B].astype(jnp.int32)  # unique rows
    batch_labels = dataset_labels[index]

    # block_b=8 with B=16 -> a 2-step pipelined grid in the CE kernel.
    crit = SELCLossPallas(dataset_labels, num_classes=C, es=10, momentum=0.9,
                          block_b=8)

    # ---------------- Branch 1: epoch <= es -> cross entropy ---------------- #
    ce = jax.block_until_ready(crit.forward(logits, batch_labels, index, epoch=5))

    logsm = jax.nn.log_softmax(logits, axis=1)
    ce_ref = -jnp.mean(logsm[jnp.arange(B), batch_labels])
    assert jnp.allclose(ce, ce_ref, atol=1e-5, rtol=1e-5), (ce, ce_ref)

    # ------------- Branch 2: epoch > es -> SELC soft-label loss ------------- #
    # Snapshot what we need BEFORE the call (the table buffer is donated).
    old_rows = crit.soft_labels[index]
    untouched_mask = jnp.ones((N,), dtype=bool).at[index].set(False)
    untouched_before = crit.soft_labels[untouched_mask]

    selc = jax.block_until_ready(crit.forward(logits, batch_labels, index, epoch=11))
    soft_after = jax.block_until_ready(crit.soft_labels)

    new_rows_ref = 0.9 * old_rows + 0.1 * jax.nn.softmax(logits, axis=1)
    selc_ref = jnp.mean(-jnp.sum(logsm * new_rows_ref, axis=1))
    assert jnp.allclose(selc, selc_ref, atol=1e-5, rtol=1e-5), (selc, selc_ref)
    assert jnp.allclose(soft_after[index], new_rows_ref, atol=1e-5)
    assert jnp.allclose(soft_after[untouched_mask], untouched_before)

    print("KERNEL_OK")
</pallas_src>

<mosaic_0001>
module attributes {stable_mosaic.version = 11 : i64} {
  func.func @_ce_kernel(%arg0: i32, %arg1: memref<8x16xf32, #tpu.memory_space<vmem>>, %arg2: memref<8x1xi32, #tpu.memory_space<vmem>>, %arg3: memref<8x1xf32, #tpu.memory_space<vmem>>) attributes {dimension_semantics = [#tpu.dimension_semantics<parallel>], iteration_bounds = array<i64: 2>, scalar_prefetch = 0 : i64, scratch_operands = 0 : i64, tpu.core_type = #tpu.core_type<tc>, window_params = [{transform_indices = @transform_0, window_bounds = array<i64: 8, 16>}, {transform_indices = @transform_1, window_bounds = array<i64: 8, 1>}, {transform_indices = @transform_2, window_bounds = array<i64: 8, 1>}]} {
    %c0 = arith.constant 0 : index
    %c0_0 = arith.constant 0 : index
    %0 = vector.load %arg1[%c0, %c0_0] : memref<8x16xf32, #tpu.memory_space<vmem>>, vector<8x16xf32>
    %cst = arith.constant dense<0xFF800000> : vector<8xf32>
    %1 = vector.multi_reduction <maximumf>, %0, %cst [1] : vector<8x16xf32> to vector<8xf32>
    %2 = vector.shape_cast %1 : vector<8xf32> to vector<8x1xf32>
    %3 = vector.broadcast %2 : vector<8x1xf32> to vector<8x16xf32>
    %4 = arith.subf %0, %3 : vector<8x16xf32>
    %5 = math.exp %4 : vector<8x16xf32>
    %cst_1 = arith.constant dense<0.000000e+00> : vector<8xf32>
    %6 = vector.multi_reduction <add>, %5, %cst_1 [1] : vector<8x16xf32> to vector<8xf32>
    %7 = vector.shape_cast %6 : vector<8xf32> to vector<8x1xf32>
    %8 = tpu.iota {dimensions = array<i32: 1>} : vector<8x16xi32>
    %c0_2 = arith.constant 0 : index
    %c0_3 = arith.constant 0 : index
    %9 = vector.load %arg2[%c0_2, %c0_3] : memref<8x1xi32, #tpu.memory_space<vmem>>, vector<8x1xi32>
    %10 = vector.broadcast %9 : vector<8x1xi32> to vector<8x16xi32>
    %11 = arith.cmpi eq, %8, %10 : vector<8x16xi32>
    %12 = arith.extui %11 : vector<8x16xi1> to vector<8x16xi32>
    %13 = arith.sitofp %12 : vector<8x16xi32> to vector<8x16xf32>
    %14 = arith.mulf %0, %13 : vector<8x16xf32>
    %cst_4 = arith.constant dense<0.000000e+00> : vector<8xf32>
    %15 = vector.multi_reduction <add>, %14, %cst_4 [1] : vector<8x16xf32> to vector<8xf32>
    %16 = vector.shape_cast %15 : vector<8xf32> to vector<8x1xf32>
    %17 = math.log %7 : vector<8x1xf32>
    %18 = arith.addf %2, %17 : vector<8x1xf32>
    %19 = arith.subf %18, %16 : vector<8x1xf32>
    %c0_5 = arith.constant 0 : index
    %c0_6 = arith.constant 0 : index
    %20 = vector.load %arg3[%c0_5, %c0_6] : memref<8x1xf32, #tpu.memory_space<vmem>>, vector<8x1xf32>
    tpu.vector_store %arg3[%c0_5, %c0_6], %19 {strides = array<i32>} : memref<8x1xf32, #tpu.memory_space<vmem>>, vector<8x1xf32>,
    return
  }
  func.func @transform_0(%arg0: i32) -> (i32, i32) {
    %c0_i32 = arith.constant 0 : i32
    %c0_i32_0 = arith.constant 0 : i32
    return %arg0, %c0_i32 : i32, i32
  }
  func.func @transform_1(%arg0: i32) -> (i32, i32) {
    %c0_i32 = arith.constant 0 : i32
    %c0_i32_0 = arith.constant 0 : i32
    return %arg0, %c0_i32 : i32, i32
  }
  func.func @transform_2(%arg0: i32) -> (i32, i32) {
    %c0_i32 = arith.constant 0 : i32
    %c0_i32_0 = arith.constant 0 : i32
    return %arg0, %c0_i32 : i32, i32
  }
}

</mosaic_0001>

<bundles_post_ra>
// kernel: ce_loss_pallas.1
= control target key start
LH: loop header
LB: loop body
LE: loop exit
PB: predicated region body
PF: predicated region fallthrough
CT: control target
= control target key end

     0   :  { %s302_s9 = smov 0   ;;  %s330_s0 = inlined_call_operand.vmem [shape: f32[16,16], index: 0, kind: input, shape index: {}]   ;;  %s331_s1 = inlined_call_operand.vmem [shape: s32[16,1], index: 1, kind: input, shape index: {}]   ;;  %s332_s2 = inlined_call_operand.vmem [shape: f32[16,1], index: 2, kind: output, shape index: {}]  }
   0x1 LB: > { %s251_s10 = sadd.s32 4294967295, %s283_s9   ;;  %p255_p0 = scmp.ge.s32.totalorder %s283_s9, 1  ;;  %s283_s9 = sphi %s302_s9, %s12_s9  }
   0x2   : > { %p120_p1 = scmp.lt.s32.totalorder %s283_s9, 3 }
   0x4   : > { %p121_p2 = pnand %p255_p0, %p120_p1 }
   0x5   : > { %p144_p3 = scmp.lt.s32.totalorder (!%p121_p2), %s251_s10, 1 }
   0x6   : > { %124 = sbr.rel (%p121_p2) target bundleno = 275 (0x113), region = 28 }
   0xb   : > { %v285_v0 = vmov 0   ;;  %s334_s10 = smov (!%p144_p3, %s251_s10), 1  ;;  %vm157_vm0 = vcmask 130048   ;;  %v167_v9 = vlaneseq  ;;  %v286_v12 = vmov 0.0  }
   0xc   : > { %272 = vset.pattern.permute.xlu0 %v285_v0  ;;  %s310_s11 = sshll.u32 %s334_s10, 3  ;;  %vm184_vm2 = vcmask 7168  }
   0xd   : > { %s147_s14 = scalar_lea.vmem %s330_s0, %s310_s11  ;;  %s151_s17 = scalar_lea.vmem %s331_s1, %s310_s11  ;;  %v168_v10 = vand.u32 127, %v167_v9 }
   0xe   : > { %v156_v1 = vld [vmem:[%s147_s14] sm:$0xff]  ;;  %s155_s20 = scalar_lea.vmem %s332_s2, %s310_s11 }
   0xf   : > { %v158_v2 = vsel %vm157_vm0, %v156_v1, -inf  ;;  %v169_v3 = vld [vmem:[%s151_s17] sm:$0xff] }
  0x10   : > { %159 = vmax.xlane.f32.xlu0 %v158_v2 }
  0x24   : > { %171 = vperm.xlu0 %272, %v169_v3  }
  0x83   : > { %v160_v4 = vpop.xlane.xlu0 %159 }
  0x84   : > { %v161_v5 = vsub.f32 %v156_v1, %v160_v4 }
  0x86   : > { %v162_v6 = vmul.f32 1.442695, %v161_v5 }
  0x88   : > { %273 = vpow2.f32 %v162_v6 }
  0x8e   : > { %v274_v7 = vpop.eup %273 }
  0x8f   : > { %v164_v8 = vsel %vm157_vm0, %v274_v7, 0.0 }
  0x90   : > { %165 = vadd.xlane.f32.xlu1 %v164_v8 }
  0x96   : > { %v172_v11 = vpop.permute.xlu0 %171 }
  0x97   : > { %vm173_vm1 = vcmp.eq.s32.totalorder %v168_v10, %v172_v11 }
  0x98   : > { %v259_v13 = vsel %vm173_vm1, 1.0, %v286_v12 }
  0x99   : > { %v176_v14 = vmul.f32 %v259_v13, %v156_v1 }
  0x9b   : > { %v177_v15 = vsel %vm157_vm0, %v176_v14, 0.0 }
  0x9c   : > { %178 = vadd.xlane.f32.xlu1 %v177_v15 }
 0x103   : > { %v166_v16 = vpop.xlane.xlu1 %165 }
 0x104   : > { %275 = vlog2.f32 %v166_v16 }
 0x10a   : > { %v276_v17 = vpop.eup %275 }
 0x10b   : > { %v181_v18 = vmul.f32 0.6931472, %v276_v17 }
 0x10d   : > { %v182_v19 = vadd.f32 %v181_v18, %v160_v4 }
 0x10f   : > { %v179_v20 = vpop.xlane.xlu1 %178 }
 0x110   : > { %v183_v21 = vsub.f32 %v182_v19, %v179_v20 }
 0x112   : > { %185 = vst.msk [vmem:[%s155_s20] sm:$0xff] %vm184_vm2, %v183_v21 }
 0x113 PF: > { %s12_s9 = sadd.s32 1, %s283_s9  }
 0x114   : > { %p9_p4 = scmp.ge.s32.totalorder %s12_s9, 4  }
 0x116   :  { %11 = sbr.rel (!%p9_p4) target bundleno = 1 (0x1), region = 61 }

</bundles_post_ra>
